<compile_context>
chip_gen: v5e
topology: v5e:2x2
jax: 0.10.0
libtpu: 0.0.40
codegen_flags: <defaults>
</compile_context>

<pallas_src>
from functools import partial

import jax
import jax.numpy as jnp
from jax.experimental import pallas as pl
from jax.experimental.pallas import tpu as pltpu

# ----------------------------- model config ---------------------------------
STATE_DIMS = (32, 32, 32)       # state_dims[i] for each latent layer
OUT_DIM = 64                    # output dim of the final transform
TOTAL_DIM = sum(STATE_DIMS)     # x is [batch, TOTAL_DIM] = [batch, 96]
BATCH = 8                       # small-shape test batch
MULTI_BATCH = 48                # second test batch: >= 2 grid steps (v7x sharding path)
MAX_BLOCK_ROWS = 4096           # upper bound on batch-block rows per grid step
SMALL_BATCH_THRESHOLD = 1024    # below this, plain XLA fusion beats a standalone kernel

_INDICES = [0]
for _d in STATE_DIMS:
    _INDICES.append(_INDICES[-1] + _d)


# ------------------------------ Pallas kernel --------------------------------
def _decoder_kernel(x_ref, w01_ref, w2_ref, b_ref, o_ref):
    """One fused decoder chain for a block of rows.

    x_ref  : (bm, 96)    raw x block; static lane-offset slices inside the kernel
    w01_ref: (2, 32, 32) weights of the first two (tanh) layers (VMEM-resident)
    w2_ref : (32, 64)    final layer weight (VMEM-resident)
    b_ref  : (3, 64)     all three biases packed into one small tile (VMEM-resident)
    o_ref  : (bm, 64)    output block (64 == full out dim)
    """
    d0, d1, d2 = STATE_DIMS
    x0 = x_ref[:, :d0]
    x1 = x_ref[:, d0:d0 + d1]
    x2 = x_ref[:, d0 + d1:d0 + d1 + d2]

    # layer 0: result starts at zeros, so result + x0 == x0
    h = jnp.dot(x0, w01_ref[0], preferred_element_type=jnp.float32)
    h = jnp.tanh(h + b_ref[0:1, :d1])

    # layer 1
    h = jnp.dot(h + x1, w01_ref[1], preferred_element_type=jnp.float32)
    h = jnp.tanh(h + b_ref[1:2, :d2])

    # layer 2 (final transform: plain linear)
    o_ref[...] = (
        jnp.dot(h + x2, w2_ref[...], preferred_element_type=jnp.float32)
        + b_ref[2:3, :OUT_DIM]
    )


# --------------------------- one-time param packing --------------------------
def pack_params(params):
    """Hoisted out of the per-call path: run once when parameters are loaded.

    params = ((w0, b0), (w1, b1), (w2, b2)) with w_i shaped (in, out).
    NOTE: a real PyTorch nn.Linear stores weight as (out, in) and bias as 1-D;
    transpose the weights when importing real checkpoints (ravel handles biases).
    """
    (w0, b0), (w1, b1), (w2, b2) = params
    w01 = jnp.stack([w0, w1], axis=0).astype(jnp.float32)        # (2, 32, 32)
    bp = jnp.zeros((3, OUT_DIM), jnp.float32)
    bp = bp.at[0, :STATE_DIMS[1]].set(jnp.ravel(b0))
    bp = bp.at[1, :STATE_DIMS[2]].set(jnp.ravel(b1))
    bp = bp.at[2, :OUT_DIM].set(jnp.ravel(b2))
    return w01, w2.astype(jnp.float32), bp


# ------------------------------ forward wrappers ------------------------------
def _choose_block_rows(batch):
    """Batch-block rows: big enough to amortize per-step overhead, but always
    >= 2 grid steps for large batches so v7x's second TensorCore is used."""
    if batch <= 8:
        return batch                      # block dims == full array dims -> legal
    target = pl.cdiv(batch, 2)            # ensure at least 2 grid steps
    target = ((target + 7) // 8) * 8      # sublane-aligned
    return max(8, min(MAX_BLOCK_ROWS, target))


@jax.jit
def _pallas_forward(x, w01, w2, bp):
    batch = x.shape[0]
    bm = _choose_block_rows(batch)
    grid = (pl.cdiv(batch, bm),)

    d0, d1, d2 = STATE_DIMS
    return pl.pallas_call(
        _decoder_kernel,
        out_shape=jax.ShapeDtypeStruct((batch, OUT_DIM), jnp.float32),
        grid=grid,
        in_specs=[
            pl.BlockSpec((bm, TOTAL_DIM), lambda i: (i, 0)),   # x block (96 == full dim)
            pl.BlockSpec((2, d0, d1), lambda i: (0, 0, 0)),    # w0/w1   (resident)
            pl.BlockSpec((d2, OUT_DIM), lambda i: (0, 0)),     # w2      (resident)
            pl.BlockSpec((3, OUT_DIM), lambda i: (0, 0)),      # biases  (resident)
        ],
        out_specs=pl.BlockSpec((bm, OUT_DIM), lambda i: (i, 0)),
        compiler_params=pltpu.CompilerParams(
            dimension_semantics=("parallel",),   # shard batch blocks across v7x's 2 TCs
        ),
    )(x, w01, w2, bp)


@jax.jit
def _xla_forward(x, w01, w2, bp):
    """Plain fused XLA path for tiny batches (kernel launch would be pure overhead)."""
    d0, d1, d2 = STATE_DIMS
    h = jnp.tanh(x[:, :d0] @ w01[0] + bp[0:1, :d1])
    h = jnp.tanh((h + x[:, d0:d0 + d1]) @ w01[1] + bp[1:2, :d2])
    return (h + x[:, d0 + d1:]) @ w2 + bp[2:3, :OUT_DIM]


def generative_model_forward(x, packed_params, force_pallas=False):
    """Dispatch: Pallas kernel above the batch threshold, XLA fusion below it."""
    if force_pallas or x.shape[0] >= SMALL_BATCH_THRESHOLD:
        return _pallas_forward(x, *packed_params)
    return _xla_forward(x, *packed_params)


# ----------------------------- pure-JAX reference ----------------------------
def _reference_forward(x, params):
    result = jnp.zeros((STATE_DIMS[0],), jnp.float32)  # broadcasts, same as torch
    n = len(params)
    for i, (w, b) in enumerate(params):
        inp = x[:, _INDICES[i]:_INDICES[i + 1]]
        h = (result + inp) @ w + jnp.ravel(b)
        result = h if i == n - 1 else jnp.tanh(h)
    return result


# ------------------------------ param init -----------------------------------
def _init_params(key):
    dims_in = list(STATE_DIMS)
    dims_out = list(STATE_DIMS[1:]) + [OUT_DIM]
    params = []
    for din, dout in zip(dims_in, dims_out):
        key, kw, kb = jax.random.split(key, 3)
        w = jax.random.normal(kw, (din, dout), jnp.float32) * 0.1
        b = jax.random.normal(kb, (1, dout), jnp.float32) * 0.01
        params.append((w, b))
    return tuple(params)


# --------------------------------- main ---------------------------------------
if __name__ == "__main__":
    key = jax.random.PRNGKey(0)
    key, kx = jax.random.split(key)
    params = _init_params(key)

    # One-time packing (hoisted out of the per-call path).
    packed = pack_params(params)
    packed = tuple(jax.block_until_ready(p) for p in packed)

    # Small batch: single grid step.
    x_small = jax.random.normal(kx, (BATCH, TOTAL_DIM), jnp.float32)
    out = jax.block_until_ready(
        generative_model_forward(x_small, packed, force_pallas=True))
    ref = _reference_forward(x_small, params)
    assert out.shape == (BATCH, OUT_DIM), out.shape
    assert jnp.allclose(out, ref, atol=1e-5, rtol=1e-5), "mismatch vs reference (small)"

    # Larger batch: >= 2 grid steps (exercises the batch-parallel grid path).
    key, kx2 = jax.random.split(key)
    x_multi = jax.random.normal(kx2, (MULTI_BATCH, TOTAL_DIM), jnp.float32)
    out2 = jax.block_until_ready(
        generative_model_forward(x_multi, packed, force_pallas=True))
    ref2 = _reference_forward(x_multi, params)
    assert out2.shape == (MULTI_BATCH, OUT_DIM), out2.shape
    assert jnp.allclose(out2, ref2, atol=1e-5, rtol=1e-5), "mismatch vs reference (multi)"

    # TODO(synk): GenerativeModel.sample() (prior randn + sigmoid) is host-side glue,
    # intentionally not part of the kernel.
    print("KERNEL_OK")
</pallas_src>

<mosaic_0001>
module attributes {stable_mosaic.version = 11 : i64} {
  func.func @_decoder_kernel(%arg0: i32, %arg1: memref<8x96xf32, #tpu.memory_space<vmem>>, %arg2: memref<2x32x32xf32, #tpu.memory_space<vmem>>, %arg3: memref<32x64xf32, #tpu.memory_space<vmem>>, %arg4: memref<3x64xf32, #tpu.memory_space<vmem>>, %arg5: memref<8x64xf32, #tpu.memory_space<vmem>>) attributes {dimension_semantics = [#tpu.dimension_semantics<parallel>], iteration_bounds = array<i64: 1>, scalar_prefetch = 0 : i64, scratch_operands = 0 : i64, tpu.core_type = #tpu.core_type<tc>, window_params = [{transform_indices = @transform_0, window_bounds = array<i64: 8, 96>}, {pipeline_mode = #tpu.pipeline_mode<synchronous>, transform_indices = @transform_1, window_bounds = array<i64: 2, 32, 32>}, {pipeline_mode = #tpu.pipeline_mode<synchronous>, transform_indices = @transform_2, window_bounds = array<i64: 32, 64>}, {pipeline_mode = #tpu.pipeline_mode<synchronous>, transform_indices = @transform_3, window_bounds = array<i64: 3, 64>}, {transform_indices = @transform_4, window_bounds = array<i64: 8, 64>}]} {
    %c0 = arith.constant 0 : index
    %c0_0 = arith.constant 0 : index
    %0 = vector.load %arg1[%c0, %c0_0] : memref<8x96xf32, #tpu.memory_space<vmem>>, vector<8x32xf32>
    %c0_1 = arith.constant 0 : index
    %c32 = arith.constant 32 : index
    %1 = vector.load %arg1[%c0_1, %c32] : memref<8x96xf32, #tpu.memory_space<vmem>>, vector<8x32xf32>
    %c0_2 = arith.constant 0 : index
    %c64 = arith.constant 64 : index
    %2 = vector.load %arg1[%c0_2, %c64] : memref<8x96xf32, #tpu.memory_space<vmem>>, vector<8x32xf32>
    %c0_3 = arith.constant 0 : index
    %c0_4 = arith.constant 0 : index
    %c0_5 = arith.constant 0 : index
    %3 = vector.load %arg2[%c0_3, %c0_4, %c0_5] : memref<2x32x32xf32, #tpu.memory_space<vmem>>, vector<1x32x32xf32>
    %4 = vector.shape_cast %3 : vector<1x32x32xf32> to vector<32x32xf32>
    %cst = arith.constant dense<0.000000e+00> : vector<8x32xf32>
    %5 = tpu.matmul %0, %4, %cst {dimension_numbers = #tpu.dot_dimension_numbers<[1], [0], [0], [1], [0, 0, 1, 1], [], []>} : vector<8x32xf32>, vector<32x32xf32>, vector<8x32xf32> -> vector<8x32xf32>
    %c0_6 = arith.constant 0 : index
    %c0_7 = arith.constant 0 : index
    %6 = vector.load %arg4[%c0_6, %c0_7] : memref<3x64xf32, #tpu.memory_space<vmem>>, vector<1x32xf32>
    %7 = vector.broadcast %6 : vector<1x32xf32> to vector<8x32xf32>
    %8 = arith.addf %5, %7 : vector<8x32xf32>
    %9 = math.tanh %8 : vector<8x32xf32>
    %10 = arith.addf %9, %1 : vector<8x32xf32>
    %c1 = arith.constant 1 : index
    %c0_8 = arith.constant 0 : index
    %c0_9 = arith.constant 0 : index
    %11 = vector.load %arg2[%c1, %c0_8, %c0_9] : memref<2x32x32xf32, #tpu.memory_space<vmem>>, vector<1x32x32xf32>
    %12 = vector.shape_cast %11 : vector<1x32x32xf32> to vector<32x32xf32>
    %cst_10 = arith.constant dense<0.000000e+00> : vector<8x32xf32>
    %13 = tpu.matmul %10, %12, %cst_10 {dimension_numbers = #tpu.dot_dimension_numbers<[1], [0], [0], [1], [0, 0, 1, 1], [], []>} : vector<8x32xf32>, vector<32x32xf32>, vector<8x32xf32> -> vector<8x32xf32>
    %c1_11 = arith.constant 1 : index
    %c0_12 = arith.constant 0 : index
    %14 = vector.load %arg4[%c1_11, %c0_12] : memref<3x64xf32, #tpu.memory_space<vmem>>, vector<1x32xf32>
    %15 = vector.broadcast %14 : vector<1x32xf32> to vector<8x32xf32>
    %16 = arith.addf %13, %15 : vector<8x32xf32>
    %17 = math.tanh %16 : vector<8x32xf32>
    %18 = arith.addf %17, %2 : vector<8x32xf32>
    %c0_13 = arith.constant 0 : index
    %c0_14 = arith.constant 0 : index
    %19 = vector.load %arg3[%c0_13, %c0_14] : memref<32x64xf32, #tpu.memory_space<vmem>>, vector<32x64xf32>
    %cst_15 = arith.constant dense<0.000000e+00> : vector<8x64xf32>
    %20 = tpu.matmul %18, %19, %cst_15 {dimension_numbers = #tpu.dot_dimension_numbers<[1], [0], [0], [1], [0, 0, 1, 1], [], []>} : vector<8x32xf32>, vector<32x64xf32>, vector<8x64xf32> -> vector<8x64xf32>
    %c2 = arith.constant 2 : index
    %c0_16 = arith.constant 0 : index
    %21 = vector.load %arg4[%c2, %c0_16] : memref<3x64xf32, #tpu.memory_space<vmem>>, vector<1x64xf32>
    %22 = vector.broadcast %21 : vector<1x64xf32> to vector<8x64xf32>
    %23 = arith.addf %20, %22 : vector<8x64xf32>
    %c0_17 = arith.constant 0 : index
    %c0_18 = arith.constant 0 : index
    %24 = vector.load %arg5[%c0_17, %c0_18] : memref<8x64xf32, #tpu.memory_space<vmem>>, vector<8x64xf32>
    tpu.vector_store %arg5[%c0_17, %c0_18], %23 {strides = array<i32>} : memref<8x64xf32, #tpu.memory_space<vmem>>, vector<8x64xf32>,
    return
  }
  func.func @transform_0(%arg0: i32) -> (i32, i32) {
    %c0_i32 = arith.constant 0 : i32
    %c0_i32_0 = arith.constant 0 : i32
    return %arg0, %c0_i32 : i32, i32
  }
  func.func @transform_1(%arg0: i32) -> (i32, i32, i32) {
    %c0_i32 = arith.constant 0 : i32
    %c0_i32_0 = arith.constant 0 : i32
    %c0_i32_1 = arith.constant 0 : i32
    %c0_i32_2 = arith.constant 0 : i32
    return %c0_i32, %c0_i32_0, %c0_i32_1 : i32, i32, i32
  }
  func.func @transform_2(%arg0: i32) -> (i32, i32) {
    %c0_i32 = arith.constant 0 : i32
    %c0_i32_0 = arith.constant 0 : i32
    %c0_i32_1 = arith.constant 0 : i32
    return %c0_i32, %c0_i32_0 : i32, i32
  }
  func.func @transform_3(%arg0: i32) -> (i32, i32) {
    %c0_i32 = arith.constant 0 : i32
    %c0_i32_0 = arith.constant 0 : i32
    %c0_i32_1 = arith.constant 0 : i32
    return %c0_i32, %c0_i32_0 : i32, i32
  }
  func.func @transform_4(%arg0: i32) -> (i32, i32) {
    %c0_i32 = arith.constant 0 : i32
    %c0_i32_0 = arith.constant 0 : i32
    return %arg0, %c0_i32 : i32, i32
  }
}

</mosaic_0001>

<bundles_post_ra>
// kernel: _pallas_forward.1
= control target key start
LH: loop header
LB: loop body
LE: loop exit
PB: predicated region body
PF: predicated region fallthrough
CT: control target
= control target key end

     0   :  { %9 = vsyncpa [#allocation3], 0  ;;  %s397_s0 = inlined_call_operand.hbm [shape: f32[8,96], index: 0, kind: input, shape index: {}]   ;;  %s398_s1 = inlined_call_operand.hbm [shape: f32[2,32,32], index: 1, kind: input, shape index: {}]   ;;  %s399_s2 = inlined_call_operand.hbm [shape: f32[32,64], index: 2, kind: input, shape index: {}]   ;;  %s400_s3 = inlined_call_operand.hbm [shape: f32[3,64], index: 3, kind: input, shape index: {}]   ;;  %s401_s4 = inlined_call_operand.hbm [shape: f32[8,64], index: 4, kind: output, shape index: {}]  }
   0x1   :  { %10 = vsyncpa [#allocation6], 0 }
   0x2   :  { %11 = vsyncpa [#allocation9], 0  ;;  %s28_s17 = sshll.u32 %s398_s1, 4  ;;  %s29_s17 = int_to_ptr.hbm [resolvable:$true] %s28_s17 }
   0x3   :  { %12 = vsyncpa [#allocation4], 0  ;;  %s345_s18 = smov [#allocation5]   ;;  %s18_s22 = sshll.u32 %s397_s0, 4  ;;  %s19_s22 = int_to_ptr.hbm [resolvable:$true] %s18_s22 }
   0x4   :  { %s30_s19 = sshll.u32 %s345_s18, 4  ;;  %s346_s23 = smov 128   ;;  %s31_s19 = int_to_ptr.vmem [resolvable:$true] %s30_s19 }
   0x5   :  { %s347_s24 = smov 8   ;;  %s348_s25 = smov [#allocation2]  }
   0x6   :  { %36 = dma.hbm_to_vmem [thread:$0]  %s29_s17, 1024, %s31_s19, [#allocation6], %s346_s23, %s346_s23, %s347_s24  }
   0x7   :  { %s20_s26 = sshll.u32 %s348_s25, 4  ;;  %s41_s29 = sshll.u32 %s399_s2, 4  ;;  %s21_s26 = int_to_ptr.vmem [resolvable:$true] %s20_s26  ;;  %s42_s29 = int_to_ptr.hbm [resolvable:$true] %s41_s29 }
   0x8   :  { %23 = dma.hbm_to_vmem [thread:$0]  %s19_s22, 128, %s21_s26, [#allocation3]  }
   0x9   :  { %s55_s5 = sshll.u32 %s400_s3, 4  ;;  %s349_s6 = smov [#allocation7]   ;;  %s56_s5 = int_to_ptr.hbm [resolvable:$true] %s55_s5 }
   0xa   :  { %s43_s7 = sshll.u32 %s349_s6, 4  ;;  %s350_s0 = smov [#allocation8]   ;;  %s44_s7 = int_to_ptr.vmem [resolvable:$true] %s43_s7 }
   0xb   :  { %49 = dma.hbm_to_vmem [thread:$0]  %s42_s29, 512, %s44_s7, [#allocation6], %s346_s23, %s346_s23, %s347_s24  }
   0xc   :  { %s57_s8 = sshll.u32 %s350_s0, 4  ;;  %s58_s8 = int_to_ptr.vmem [resolvable:$true] %s57_s8 }
   0xd   :  { %60 = dma.hbm_to_vmem [thread:$0]  %s56_s5, 64, %s58_s8, [#allocation9]  }
   0xe   :  { %337 = dma.done.wait [#allocation3], 128  }
   0xf   :  { %338 = vsyncadd [#allocation3], 4294967168 }
  0x10   :  { %339 = dma.done.wait [#allocation6], 1536  }
  0x11   :  { %340 = vsyncadd [#allocation6], 4294965760 }
  0x12   :  { %341 = dma.done.wait [#allocation9], 64  }
  0x13   :  { %342 = vsyncadd [#allocation9], 4294967232  ;;  %v81_v0 = vld [vmem:[#allocation5 + $0x18] sm:$0xff]  ;;  %v80_v1 = vld [vmem:[#allocation5 + $0x10] sm:$0xff]  ;;  %s351_s2 = smov 96   ;;  %vm84_vm0 = vcmask 261120  }
  0x14   :  { %100 = vmatpush.msra.mxu0 %v81_v0  ;;  %v77_v2 = vld [vmem:[#allocation2] sm:$0xff]  ;;  %v79_v3 = vld [vmem:[#allocation5 + $0x8] sm:$0xff]  ;;  %v78_v4 = vld [vmem:[#allocation5] sm:$0xff]  ;;  %s352_s3 = smov 64   ;;  %s353_s9 = smov [#allocation10]   ;;  %vm177_vm1 = vcmask 523264  }
  0x15   :  { %109 = vrot.lane.b32.xlu0 %v77_v2, %s351_s2  ;;  %v117_v5 = vld [vmem:[#allocation5 + $0x38] sm:$0xff]  ;;  %v116_v6 = vld [vmem:[#allocation5 + $0x30] sm:$0xff]  ;;  %v115_v7 = vld [vmem:[#allocation5 + $0x28] sm:$0xff]  ;;  %s184_s10 = sshll.u32 %s353_s9, 4  ;;  %s186_s13 = sshll.u32 %s401_s4, 4  ;;  %s185_s10 = int_to_ptr.vmem [resolvable:$true] %s184_s10  ;;  %s187_s13 = int_to_ptr.hbm [resolvable:$true] %s186_s13 }
  0x16   :  { %101 = vmatpush.msra.mxu0 %v80_v1  ;;  %135 = vmatpush.msra.mxu1 %v117_v5  ;;  %v114_v8 = vld [vmem:[#allocation5 + $0x20] sm:$0xff]  ;;  %v151_v15 = vld [vmem:[#allocation7 + $0x18] sm:$0xff]  ;;  %v150_v16 = vld [vmem:[#allocation7 + $0x10] sm:$0xff] }
  0x17   :  { %v210_v9 = vld [vmem:[#allocation8] ss:$0 sm:$0xff]  ;;  %169 = vmatpush.msra.mxu2 %v151_v15  ;;  %v149_v17 = vld [vmem:[#allocation7 + $0x8] sm:$0xff]  ;;  %v211_v19 = vld [vmem:[#allocation8 + $0x1] ss:$0 sm:$0xff] }
  0x18   :  { %102 = vmatpush.msra.mxu0 %v79_v3  ;;  %136 = vmatpush.msra.mxu1 %v116_v6  ;;  %v148_v18 = vld [vmem:[#allocation7] sm:$0xff] }
  0x19   :  { %170 = vmatpush.msra.mxu2 %v150_v16  ;;  %v212_v25 = vld [vmem:[#allocation8 + $0x2] ss:$0 sm:$0xff] }
  0x1a   :  { %103 = vmatpush.msra.mxu0 %v78_v4  ;;  %137 = vmatpush.msra.mxu1 %v115_v7 }
  0x1b   :  { %198 = vmatmul.msk.f32.vlgmr.msra.gmra.mxu0 %vm84_vm0, %v77_v2  ;;  %171 = vmatpush.msra.mxu2 %v149_v17 }
  0x1c   :  { %138 = vmatpush.msra.mxu1 %v114_v8 }
  0x1d   :  { %144 = vrot.lane.b32.xlu0 %v77_v2, %s352_s3  ;;  %172 = vmatpush.msra.mxu2 %v148_v18 }
  0x87   :  { %v110_v12 = vpop.permute.xlu0 %109 }
  0x8f   :  { %v145_v22 = vpop.permute.xlu0 %144 }
  0x98   :  { %v105_v10 = vpop.f32.mrf.mxu0 }
  0x99   :  { %v106_v11 = vadd.f32 %v210_v9, %v105_v10 }
  0x9b   :  { %213 = vtanh.f32 %v106_v11 }
  0xa1   :  { %v214_v13 = vpop.eup %213 }
  0xa2   :  { %v112_v14 = vadd.f32 %v214_v13, %v110_v12 }
  0xa4   :  { %199 = vmatmul.msk.f32.vlgmr.msra.gmra.mxu1 %vm84_vm0, %v112_v14 }
 0x121   :  { %v140_v20 = vpop.f32.mrf.mxu1 }
 0x122   :  { %v141_v21 = vadd.f32 %v211_v19, %v140_v20 }
 0x124   :  { %215 = vtanh.f32 %v141_v21 }
 0x12a   :  { %v216_v23 = vpop.eup %215 }
 0x12b   :  { %v147_v24 = vadd.f32 %v216_v23, %v145_v22 }
 0x12d   :  { %200 = vmatmul.msk.f32.vlgmr.msra.gmra.mxu2 %vm84_vm0, %v147_v24 }
 0x1b0   :  { %v174_v26 = vpop.f32.mrf.mxu2 }
 0x1b1   :  { %v175_v27 = vadd.f32 %v212_v25, %v174_v26 }
 0x1b3   :  { %178 = vst.msk [vmem:[#allocation10] sm:$0xff] %vm177_vm1, %v175_v27 }
 0x1b4   :  { %189 = dma.vmem_to_hbm [thread:$0]  %s185_s10, 128, %s187_s13, [#allocation4]  }
 0x1b5   :  { %343 = dma.done.wait [#allocation4], 128  }
 0x1b6   :  { %344 = vsyncadd [#allocation4], 4294967168 }
 0x1b7   :  { %194 = vsyncpa [#allocation3], 1 }
 0x1b8   :  { %195 = vsyncpa [#allocation6], 1 }
 0x1b9   :  { %196 = vsyncpa [#allocation9], 1 }
 0x1ba   :  { %197 = vsyncpa [#allocation4], 1 }

</bundles_post_ra>
